<compile_context>
chip_gen: v7x
topology: tpu7x:2x2x1
jax: 0.10.0
libtpu: 0.0.40
codegen_flags: <defaults>
</compile_context>

<pallas_src>
import functools
import math

import jax
import jax.numpy as jnp
from jax.experimental import pallas as pl
from jax.experimental.pallas import tpu as pltpu


def _cdiv(a, b):
    return -(-a // b)


def _round_up(x, m):
    return _cdiv(x, m) * m


def _round_down(x, m):
    return (x // m) * m


def _sublane_gran(dtype):
    """Minimum sublane tile for a dtype: 8 (f32), 16 (bf16/f16), 32 (int8/fp8)."""
    bits = jnp.dtype(dtype).itemsize * 8
    return max(8, 256 // bits)


@functools.lru_cache(maxsize=None)
def _hw_params():
    """(per-block input budget bytes, vmem_limit_bytes), generation-aware."""
    phys = None
    try:
        phys = int(pltpu.get_tpu_info().vmem_capacity_bytes)
    except Exception:  # detection unavailable -> conservative defaults
        phys = None
    if phys is not None and phys >= 96 * 1024 * 1024:
        # v5e / v6e: 128 MiB physical VMEM -> bigger blocks, higher scoped limit.
        return 16 * 1024 * 1024, 56 * 1024 * 1024
    # v7x (64 MiB physical per TC) or unknown: stay well inside the scoped limit.
    return 8 * 1024 * 1024, 32 * 1024 * 1024


# ----------------------------------------------------------------------------
# Kernels
# ----------------------------------------------------------------------------

def _mean_mid_kernel(x_ref, o_ref, *acc, n_r, tr, r_total, inv_r, need_mask):
    """Reduce axis 1 of (P, R, S): R on sublanes, S (native minor dim) on lanes.

    If no scratch is passed (f32 output) the resident output block itself is
    the accumulator.
    """
    acc_ref = acc[0] if acc else o_ref
    k = pl.program_id(2)
    last = n_r - 1

    @pl.when(k == 0)
    def _():
        acc_ref[...] = jnp.zeros_like(acc_ref)

    if need_mask:
        # Full tiles: plain accumulate (no iota/compare/select filler).
        @pl.when(k < last)
        def _():
            acc_ref[...] += jnp.sum(x_ref[...], axis=1, dtype=jnp.float32)

        # Only the trailing partial tile pays for the mask.
        @pl.when(k == last)
        def _():
            xb = x_ref[...]
            row = jax.lax.broadcasted_iota(jnp.int32, xb.shape, 1) + k * tr
            xb = jnp.where(row < r_total, xb, jnp.zeros_like(xb))
            acc_ref[...] += jnp.sum(xb, axis=1, dtype=jnp.float32)
    else:
        acc_ref[...] += jnp.sum(x_ref[...], axis=1, dtype=jnp.float32)

    @pl.when(k == last)
    def _():
        o_ref[...] = (acc_ref[...] * inv_r).astype(o_ref.dtype)


def _mean_last_single_kernel(x_ref, o_ref, *, inv_r):
    """Single-step mean over the minor (lane) axis of a (TP, R) block."""
    s = jnp.sum(x_ref[...], axis=1, keepdims=True, dtype=jnp.float32)
    o_ref[...] = (s * inv_r).astype(o_ref.dtype)


def _mean_last_kernel(x_ref, o_ref, acc_ref, *, n_r, tr, r_total, inv_r,
                      need_mask, n_chunks):
    """Multi-step mean over the minor axis of (P, R), R tiled on the grid.

    Per step: fold TR lanes onto a lane-dense (TP, 128) f32 accumulator with
    pure VPU adds.  The cross-lane (XLU) reduce and the narrow (TP, 1) store
    happen once, at the final step.
    """
    r = pl.program_id(1)
    last = n_r - 1

    @pl.when(r == 0)
    def _():
        acc_ref[...] = jnp.zeros_like(acc_ref)

    def _accumulate(masked):
        xb = x_ref[...]
        if masked:
            lane = jax.lax.broadcasted_iota(jnp.int32, xb.shape, 1) + r * tr
            xb = jnp.where(lane < r_total, xb, jnp.zeros_like(xb))
        part = xb[:, 0:128].astype(jnp.float32)
        for c in range(1, n_chunks):
            part = part + xb[:, c * 128:(c + 1) * 128].astype(jnp.float32)
        acc_ref[...] += part

    if need_mask:
        @pl.when(r < last)
        def _():
            _accumulate(False)

        @pl.when(r == last)
        def _():
            _accumulate(True)
    else:
        _accumulate(False)

    @pl.when(r == last)
    def _():
        total = jnp.sum(acc_ref[...], axis=1, keepdims=True)   # single XLU reduce
        o_ref[...] = (total * inv_r).astype(o_ref.dtype)


# ----------------------------------------------------------------------------
# Wrappers
# ----------------------------------------------------------------------------

def _mean_over_middle(x3):
    """x3: (P, R, S) -> (P, S) mean over axis 1 (S stays on lanes)."""
    P, R, S = x3.shape
    elem = x3.dtype.itemsize
    gran = _sublane_gran(x3.dtype)
    budget, vmem_limit = _hw_params()

    # Lane tile: keep the native minor dim dense on lanes.
    TF = S if S <= 2048 else 2048                     # 2048 is a multiple of 128

    # Leading tile (also the output block's sublane dim).
    TP = P if P <= gran else gran

    # Megacore: expose >= 2 "parallel" blocks when it is cheap (v7x has 2 TCs).
    n_p, n_f = _cdiv(P, TP), _cdiv(S, TF)
    if n_p * n_f < 2 and S >= 256:
        TF = _round_up(_cdiv(S, 2), 128)
        n_f = _cdiv(S, TF)

    # Reduction tile: fill the VMEM budget, split R evenly (avoids the masked
    # trailing tile), dtype-aware sublane granularity.
    rows_budget = max(gran, budget // max(1, TP * TF * elem))
    if rows_budget >= R:
        TR = R
        # R (and maybe S) small: grow the leading tile to fill the budget.
        tp_grow = _round_down(budget // max(1, R * TF * elem), gran)
        tp_grow = min(tp_grow, _round_down(budget // max(1, TF * 8), gran))
        if n_f == 1 and P >= 2 * gran:
            tp_grow = min(tp_grow, _round_down(P // 2, gran))   # keep 2 blocks
        TP = min(P, max(TP, tp_grow))
    else:
        tr_cap = _round_down(rows_budget, gran)
        n_steps = _cdiv(R, tr_cap)
        TR = min(R, _round_up(_cdiv(R, n_steps), gran))

    n_p, n_f, n_r = _cdiv(P, TP), _cdiv(S, TF), _cdiv(R, TR)
    need_mask = (R % TR) != 0
    out_is_acc = x3.dtype == jnp.float32              # accumulate into o_ref

    kernel = functools.partial(
        _mean_mid_kernel, n_r=n_r, tr=TR, r_total=R, inv_r=1.0 / R,
        need_mask=need_mask)

    scratch = [] if out_is_acc else [pltpu.VMEM((TP, TF), jnp.float32)]

    return pl.pallas_call(
        kernel,
        out_shape=jax.ShapeDtypeStruct((P, S), x3.dtype),
        grid_spec=pltpu.PrefetchScalarGridSpec(
            num_scalar_prefetch=0,
            grid=(n_p, n_f, n_r),
            in_specs=[pl.BlockSpec((TP, TR, TF), lambda i, j, k: (i, k, j))],
            out_specs=pl.BlockSpec((TP, TF), lambda i, j, k: (i, j)),
            scratch_shapes=scratch),
        compiler_params=pltpu.CompilerParams(
            dimension_semantics=("parallel", "parallel", "arbitrary"),
            vmem_limit_bytes=vmem_limit),
    )(x3)


def _mean_over_last(x2):
    """x2: (P, R) -> (P, 1) mean over the minor (lane) axis."""
    P, R = x2.shape
    elem = x2.dtype.itemsize
    gran = _sublane_gran(x2.dtype)
    budget, vmem_limit = _hw_params()

    if R <= 2048:
        # Single reduction step per block; fill the budget with the P tile.
        TR = R
        tp_cap = max(gran, _round_down(budget // max(1, R * elem), gran))
        tp_cap = min(tp_cap, 8192)
        TP = P if P <= tp_cap else tp_cap
        if _cdiv(P, TP) < 2 and P > gran:             # megacore: >= 2 blocks
            TP = min(TP, _round_up(_cdiv(P, 2), gran))
        n_p = _cdiv(P, TP)

        kernel = functools.partial(_mean_last_single_kernel, inv_r=1.0 / R)
        return pl.pallas_call(
            kernel,
            out_shape=jax.ShapeDtypeStruct((P, 1), x2.dtype),
            grid_spec=pltpu.PrefetchScalarGridSpec(
                num_scalar_prefetch=0,
                grid=(n_p,),
                in_specs=[pl.BlockSpec((TP, TR), lambda i: (i, 0))],
                out_specs=pl.BlockSpec((TP, 1), lambda i: (i, 0))),
            compiler_params=pltpu.CompilerParams(
                dimension_semantics=("parallel",),
                vmem_limit_bytes=vmem_limit),
        )(x2)

    # Multi-step: R on the grid ("arbitrary"), lane-dense f32 accumulator.
    TR0 = min(2048, _round_down(R, 128))
    n_steps = _cdiv(R, TR0)
    TR = min(_round_up(_cdiv(R, n_steps), 128), TR0)  # even split, mult of 128
    n_chunks = TR // 128

    tp_cap = max(gran, _round_down(budget // max(1, TR * elem), gran))
    tp_cap = min(tp_cap, 8192)
    TP = P if P <= tp_cap else tp_cap
    if _cdiv(P, TP) < 2 and P > gran:                 # megacore: >= 2 blocks
        TP = min(TP, _round_up(_cdiv(P, 2), gran))

    n_p, n_r = _cdiv(P, TP), _cdiv(R, TR)
    need_mask = (R % TR) != 0

    kernel = functools.partial(
        _mean_last_kernel, n_r=n_r, tr=TR, r_total=R, inv_r=1.0 / R,
        need_mask=need_mask, n_chunks=n_chunks)

    return pl.pallas_call(
        kernel,
        out_shape=jax.ShapeDtypeStruct((P, 1), x2.dtype),
        grid_spec=pltpu.PrefetchScalarGridSpec(
            num_scalar_prefetch=0,
            grid=(n_p, n_r),
            in_specs=[pl.BlockSpec((TP, TR), lambda i, r: (i, r))],
            out_specs=pl.BlockSpec((TP, 1), lambda i, r: (i, 0)),
            scratch_shapes=[pltpu.VMEM((TP, 128), jnp.float32)]),
        compiler_params=pltpu.CompilerParams(
            dimension_semantics=("parallel", "arbitrary"),
            vmem_limit_bytes=vmem_limit),
    )(x2)


@functools.partial(jax.jit, static_argnames=("dim", "keepdim"))
def mean_all(x, dim=1, keepdim=False):
    """Pallas implementation of torch.Tensor.mean(dim=dim, keepdim=keepdim)."""
    ndim = x.ndim
    dim = dim % ndim
    shape = x.shape
    R = shape[dim]
    prefix = shape[:dim]
    suffix = shape[dim + 1:]
    P = math.prod(prefix) if prefix else 1
    S = math.prod(suffix) if suffix else 1

    out_shape = prefix + ((1,) if keepdim else ()) + suffix

    if S > 1:
        out = _mean_over_middle(x.reshape(P, R, S))   # (P, S)
    else:
        out = _mean_over_last(x.reshape(P, R))        # (P, 1)
    return out.reshape(out_shape)


if __name__ == "__main__":
    key = jax.random.PRNGKey(0)
    k1, k2, k3, k4 = jax.random.split(key, 4)

    # TarMAC-style usage: (batch, n_agents, hidden), mean over the agent axis.
    x = jax.random.normal(k1, (2, 8, 32), dtype=jnp.float32)
    y = mean_all(x, dim=1, keepdim=False)
    jax.block_until_ready(y)
    y_ref = jnp.mean(x, axis=1)
    assert y.shape == y_ref.shape, (y.shape, y_ref.shape)
    assert jnp.allclose(y, y_ref, atol=1e-6, rtol=1e-6)

    # Minor-axis reduction + keepdim + negative dim (single-step last path).
    y2 = mean_all(x, dim=-1, keepdim=True)
    y2_ref = jnp.mean(x, axis=-1, keepdims=True)
    assert y2.shape == y2_ref.shape, (y2.shape, y2_ref.shape)
    assert jnp.allclose(y2, y2_ref, atol=1e-6, rtol=1e-6)

    # Larger interior reduction: exercises megacore S-split + budgeted tiling.
    x3 = jax.random.normal(k2, (2, 2048, 384), dtype=jnp.float32)
    y3 = mean_all(x3, dim=1)
    y3_ref = jnp.mean(x3, axis=1)
    assert y3.shape == y3_ref.shape, (y3.shape, y3_ref.shape)
    assert jnp.allclose(y3, y3_ref, atol=1e-5, rtol=1e-5)

    # Minor-axis multi-step (R > 2048): lane-dense accumulator + gated mask.
    x4 = jax.random.normal(k3, (64, 5000), dtype=jnp.float32)
    y4 = mean_all(x4, dim=-1)
    y4_ref = jnp.mean(x4, axis=-1)
    assert y4.shape == y4_ref.shape, (y4.shape, y4_ref.shape)
    assert jnp.allclose(y4, y4_ref, atol=1e-5, rtol=1e-5)

    # bf16: dtype-aware sublane granularity + f32 scratch accumulator path.
    x5 = jax.random.normal(k4, (4, 1000, 256), dtype=jnp.bfloat16)
    y5 = mean_all(x5, dim=1)
    y5_ref = jnp.mean(x5.astype(jnp.float32), axis=1).astype(jnp.bfloat16)
    assert y5.shape == y5_ref.shape, (y5.shape, y5_ref.shape)
    assert jnp.allclose(y5.astype(jnp.float32), y5_ref.astype(jnp.float32),
                        atol=2e-2, rtol=2e-2)

    print("KERNEL_OK")
</pallas_src>

<mosaic_0001>
module attributes {stable_mosaic.version = 11 : i64} {
  func.func @_mean_mid_kernel(%arg0: i32, %arg1: i32, %arg2: i32, %arg3: memref<2x8x32xf32, #tpu.memory_space<vmem>>, %arg4: memref<2x32xf32, #tpu.memory_space<vmem>>) attributes {dimension_semantics = [#tpu.dimension_semantics<parallel>, #tpu.dimension_semantics<parallel>, #tpu.dimension_semantics<arbitrary>], iteration_bounds = array<i64: 1, 1, 1>, scalar_prefetch = 0 : i64, scratch_operands = 0 : i64, tpu.core_type = #tpu.core_type<tc>, window_params = [{transform_indices = @transform_0, window_bounds = array<i64: 2, 8, 32>}, {transform_indices = @transform_1, window_bounds = array<i64: 2, 32>}]} {
    %c0_i32 = arith.constant 0 : i32
    %0 = arith.cmpi eq, %arg2, %c0_i32 : i32
    %1 = arith.extui %0 : i1 to i32
    %c0_i32_0 = arith.constant 0 : i32
    %2 = arith.cmpi ne, %1, %c0_i32_0 : i32
    scf.if %2 {
      %cst_9 = arith.constant 0.000000e+00 : f32
      %11 = vector.broadcast %cst_9 : f32 to vector<2x32xf32>
      %c0_10 = arith.constant 0 : index
      %c0_11 = arith.constant 0 : index
      %12 = vector.load %arg4[%c0_10, %c0_11] : memref<2x32xf32, #tpu.memory_space<vmem>>, vector<2x32xf32>
      tpu.vector_store %arg4[%c0_10, %c0_11], %11 {strides = array<i32>} : memref<2x32xf32, #tpu.memory_space<vmem>>, vector<2x32xf32>,
    } else {
    }
    %c0 = arith.constant 0 : index
    %c0_1 = arith.constant 0 : index
    %3 = vector.load %arg4[%c0, %c0_1] : memref<2x32xf32, #tpu.memory_space<vmem>>, vector<2x32xf32>
    %c0_2 = arith.constant 0 : index
    %c0_3 = arith.constant 0 : index
    %c0_4 = arith.constant 0 : index
    %4 = vector.load %arg3[%c0_2, %c0_3, %c0_4] : memref<2x8x32xf32, #tpu.memory_space<vmem>>, vector<2x8x32xf32>
    %cst = arith.constant dense<0.000000e+00> : vector<2x32xf32>
    %5 = vector.multi_reduction <add>, %4, %cst [1] : vector<2x8x32xf32> to vector<2x32xf32>
    %6 = arith.addf %3, %5 : vector<2x32xf32>
    %c0_5 = arith.constant 0 : index
    %c0_6 = arith.constant 0 : index
    %7 = vector.load %arg4[%c0_5, %c0_6] : memref<2x32xf32, #tpu.memory_space<vmem>>, vector<2x32xf32>
    tpu.vector_store %arg4[%c0_5, %c0_6], %6 {strides = array<i32>} : memref<2x32xf32, #tpu.memory_space<vmem>>, vector<2x32xf32>,
    %c0_i32_7 = arith.constant 0 : i32
    %8 = arith.cmpi eq, %arg2, %c0_i32_7 : i32
    %9 = arith.extui %8 : i1 to i32
    %c0_i32_8 = arith.constant 0 : i32
    %10 = arith.cmpi ne, %9, %c0_i32_8 : i32
    scf.if %10 {
      %c0_9 = arith.constant 0 : index
      %c0_10 = arith.constant 0 : index
      %11 = vector.load %arg4[%c0_9, %c0_10] : memref<2x32xf32, #tpu.memory_space<vmem>>, vector<2x32xf32>
      %cst_11 = arith.constant 1.250000e-01 : f32
      %12 = vector.broadcast %cst_11 : f32 to vector<2x32xf32>
      %13 = arith.mulf %11, %12 : vector<2x32xf32>
      %c0_12 = arith.constant 0 : index
      %c0_13 = arith.constant 0 : index
      %14 = vector.load %arg4[%c0_12, %c0_13] : memref<2x32xf32, #tpu.memory_space<vmem>>, vector<2x32xf32>
      tpu.vector_store %arg4[%c0_12, %c0_13], %13 {strides = array<i32>} : memref<2x32xf32, #tpu.memory_space<vmem>>, vector<2x32xf32>,
    } else {
    }
    return
  }
  func.func @transform_0(%arg0: i32, %arg1: i32, %arg2: i32) -> (i32, i32, i32) {
    %c0_i32 = arith.constant 0 : i32
    return %arg0, %arg2, %arg1 : i32, i32, i32
  }
  func.func @transform_1(%arg0: i32, %arg1: i32, %arg2: i32) -> (i32, i32) {
    %c0_i32 = arith.constant 0 : i32
    return %arg0, %arg1 : i32, i32
  }
}

</mosaic_0001>

<bundles_post_ra>
// kernel: mean_all.1
= control target key start
LH: loop header
LB: loop body
LE: loop exit
PB: predicated region body
PF: predicated region fallthrough
CT: control target
= control target key end

     0   :  { %6 = vsyncpa [#allocation3], 0  ;;  %s171_s0 = inlined_call_operand.hbm [shape: f32[2,8,32], index: 0, kind: input, shape index: {}]   ;;  %s172_s1 = inlined_call_operand.hbm [shape: f32[2,32], index: 1, kind: output, shape index: {}]  }
   0x1   :  { %7 = vsyncpa [#allocation4], 0  ;;  %s129_s6 = smov [#allocation2]   ;;  %s81_s10 = scalar_lea.hbm %s171_s0, 256 }
   0x2   :  { %s13_s7 = sshll.u32 %s129_s6, 4  ;;  %p82_p0 = scmp.ne.s32.totalorder %s171_s0, %s81_s10  ;;  %s14_s7 = int_to_ptr.vmem [resolvable:$true] %s13_s7 }
   0x3   :  { %p85_p1 = scmp.lt.u32.totalorder %s81_s10, %s171_s0 }
   0x5   :  { %p87_p2 = pnand %p85_p1, %p82_p0 }
   0x7   :  { %90 = shalt.err (!%p87_p2)
}
   0x8   :  { %s91_s15 = scalar_lea.vmem %s14_s7, 256  ;;  %p96_p4 = scmp.lt.s32.totalorder %s14_s7, %s14_s7 }
   0x9   :  { %p92_p3 = scmp.ne.s32.totalorder %s14_s7, %s91_s15  ;;  %p97_p5 = scmp.lt.s32.totalorder %s91_s15, %s91_s15 }
   0xb   :  { %p98_p6 = por %p97_p5, %p96_p4 }
   0xd   :  { %p99_p7 = pnand %p98_p6, %p92_p3 }
   0xf   :  { %102 = shalt.err (!%p99_p7)
}
  0x10   :  { %s130_s16 = smov 128   ;;  %s131_s17 = smov 8  }
  0x11   :  { %19 = dma.hbm_to_vmem [thread:$0]  %s171_s0, 256, %s14_s7, [#allocation3], %s130_s16, %s130_s16, %s131_s17  }
  0x12   :  { %125 = dma.done.wait [#allocation3], 256  }
  0x13   :  { %126 = vsyncadd [#allocation3], 4294967040  ;;  %vm27_vm0 = vcmask 254976   ;;  %v132_v0 = vmov 0.0   ;;  %vm32_vm1 = vcmask 261120   ;;  %v30_v1 = vld [vmem:[#allocation2] sm:$0xff] }
  0x14   :  { %28 = vst.msk [vmem:[#allocation5] sm:$0x3] %vm27_vm0, %v132_v0  ;;  %v31_v2 = vld [vmem:[#allocation2 + $0x8] sm:$0xff]  ;;  %v33_v3 = vsel %vm32_vm1, %v30_v1, 0.0  ;;  %vm49_vm2 = vcmask 1041409   ;;  %s133_s0 = smov [#allocation5]  }
  0x15   :  { %v40_v4 = vsel %vm32_vm1, %v31_v2, 0.0  ;;  %v34_v5 = vrot.slane %v33_v3, 4  ;;  %s67_s20 = sshll.u32 %s133_s0, 4  ;;  %s68_s20 = int_to_ptr.vmem [resolvable:$true] %s67_s20 }
  0x16   :  { %v41_v6 = vrot.slane %v40_v4, 4  ;;  %s103_s21 = scalar_lea.vmem %s68_s20, 32  ;;  %p108_p9 = scmp.lt.s32.totalorder %s68_s20, %s68_s20 }
  0x17   :  { %v35_v7 = vadd.f32 %v34_v5, %v33_v3  ;;  %p104_p8 = scmp.ne.s32.totalorder %s68_s20, %s103_s21  ;;  %p109_p10 = scmp.lt.s32.totalorder %s103_s21, %s103_s21 }
  0x18   :  { %v42_v8 = vadd.f32 %v41_v6, %v40_v4 }
  0x19   :  { %v36_v9 = vrot.slane %v35_v7, 2  ;;  %p110_p11 = por %p109_p10, %p108_p9 }
  0x1a   :  { %v43_v10 = vrot.slane %v42_v8, 2 }
  0x1b   :  { %v37_v11 = vadd.f32 %v36_v9, %v35_v7  ;;  %v29_v15 = vld [vmem:[#allocation5] sm:$0x3]  ;;  %p111_p12 = pnand %p110_p11, %p104_p8 }
  0x1c   :  { %v44_v12 = vadd.f32 %v43_v10, %v42_v8 }
  0x1d   :  { %v38_v13 = vrot.slane %v37_v11, 1 }
  0x1e   :  { %v45_v14 = vrot.slane %v44_v12, 1 }
  0x1f   :  { %v39_v16 = vadd.f32 %v38_v13, %v37_v11 }
  0x20   :  { %v46_v17 = vadd.f32 %v45_v14, %v44_v12 }
  0x22   :  { %v50_v18 = vsel %vm49_vm2, %v46_v17, %v39_v16 }
  0x23   :  { %v52_v19 = vadd.f32 %v50_v18, %v29_v15 }
  0x25   :  { %54 = vst.msk [vmem:[#allocation5] sm:$0x3] %vm27_vm0, %v52_v19 }
  0x2c   :  { %v58_v20 = vld [vmem:[#allocation5] sm:$0x3] }
  0x2d   :  { %v59_v21 = vmul.f32 0.125, %v58_v20 }
  0x2f   :  { %60 = vst.msk [vmem:[#allocation5] sm:$0x3] %vm27_vm0, %v59_v21 }
  0x30   :  { %114 = shalt.err (!%p111_p12)
}
  0x31   :  { %s115_s24 = scalar_lea.hbm %s172_s1, 32 }
  0x32   :  { %p116_p13 = scmp.ne.s32.totalorder %s172_s1, %s115_s24  ;;  %p119_p0 = scmp.lt.u32.totalorder %s115_s24, %s172_s1 }
  0x34   :  { %p121_p1 = pnand %p119_p0, %p116_p13 }
  0x36   :  { %124 = shalt.err (!%p121_p1)
}
  0x37   :  { %70 = dma.vmem_to_hbm [thread:$0]  %s68_s20, 32, %s172_s1, [#allocation4]  }
  0x38   :  { %127 = dma.done.wait [#allocation4], 32  }
  0x39   :  { %128 = vsyncadd [#allocation4], 4294967264 }
  0x3a   :  { %74 = vsyncpa [#allocation3], 1 }
  0x3b   :  { %75 = vsyncpa [#allocation4], 1 }

</bundles_post_ra>
